<compile_context>
chip_gen: v7x
topology: tpu7x:2x2x1
jax: 0.10.0
libtpu: 0.0.40
codegen_flags: <defaults>
</compile_context>

<pallas_src>
import jax
import jax.numpy as jnp
from jax.experimental import pallas as pl
from jax.experimental.pallas import tpu as pltpu

# Small, 128/256-aligned dims consistent with the module's structure.
EMB = 128      # embedding_dim
HID1 = 256     # hidden_dim1
HID2 = 256     # hidden_dim2
BATCH = 64     # small example batch (any batch works with grid=(1,))


def gst_kernel(x_ref, w1_ref, b1_ref, w2_ref, b2_ref, w3_ref, b3_ref, o_ref):
    # Cast x to bf16 in-kernel: the VPU cast rides under MXU slack and avoids
    # a separate XLA cast pass (extra HBM round trip) in the wrapper.
    x = x_ref[...].astype(jnp.bfloat16)                          # (tile_b, EMB)

    # Linear(EMB -> HID1) + ReLU   (bf16 MXU inputs, f32 accumulation)
    h1 = jnp.dot(x, w1_ref[...], preferred_element_type=jnp.float32) + b1_ref[...]
    h1 = jnp.maximum(h1, 0.0).astype(jnp.bfloat16)

    # Linear(HID1 -> HID2) + ReLU
    h2 = jnp.dot(h1, w2_ref[...], preferred_element_type=jnp.float32) + b2_ref[...]
    h2 = jnp.maximum(h2, 0.0).astype(jnp.bfloat16)

    # Linear(HID2 -> EMB)
    y = jnp.dot(h2, w3_ref[...], preferred_element_type=jnp.float32) + b3_ref[...]

    # F.normalize(x, dim=1), eps=1e-12: clamp the norm at eps == clamp the sum
    # of squares at eps**2, then multiply by rsqrt (EUP) instead of sqrt+divide.
    sumsq = jnp.sum(y * y, axis=1, keepdims=True)
    inv = jax.lax.rsqrt(jnp.maximum(sumsq, 1e-24))
    o_ref[...] = (y * inv).astype(o_ref.dtype)


def gst_forward(x, w1, b1, w2, b2, w3, b3, *, num_batch_tiles=1, out_dtype=None):
    """Fused 3-layer MLP + row L2-normalize.

    num_batch_tiles=1 (default): single grid step, full arrays resident in
      VMEM, no batch padding needed -- best on single-TC v5e/v6e.
    num_batch_tiles=2: batch split into two "parallel" tiles so v7x's two
      TensorCores each get a full tile (benchmark against 1 at this size).
    Weights are used at whatever dtype they are passed in; pre-convert them to
    bf16 once at init to keep the per-call hot path cast-free.
    """
    B, E = x.shape
    assert E == EMB
    assert w1.shape == (EMB, HID1) and w2.shape == (HID1, HID2) and w3.shape == (HID2, EMB)
    assert b1.shape == (1, HID1) and b2.shape == (1, HID2) and b3.shape == (1, EMB)
    assert B % num_batch_tiles == 0, "batch must divide evenly into tiles"

    tile_b = B // num_batch_tiles
    grid = (num_batch_tiles,)
    out_dtype = x.dtype if out_dtype is None else out_dtype

    # Only cast if the caller did not already pre-convert (trace-time check;
    # no-op when weights are pre-cast bf16 / biases are already f32).
    w1, w2, w3 = (w if w.dtype == jnp.bfloat16 else w.astype(jnp.bfloat16)
                  for w in (w1, w2, w3))
    b1, b2, b3 = (b if b.dtype == jnp.float32 else b.astype(jnp.float32)
                  for b in (b1, b2, b3))

    in_specs = [
        pl.BlockSpec((tile_b, EMB), lambda i: (i, 0)),   # x tile
        pl.BlockSpec((EMB, HID1), lambda i: (0, 0)),     # w1 (resident, full)
        pl.BlockSpec((1, HID1), lambda i: (0, 0)),       # b1
        pl.BlockSpec((HID1, HID2), lambda i: (0, 0)),    # w2
        pl.BlockSpec((1, HID2), lambda i: (0, 0)),       # b2
        pl.BlockSpec((HID2, EMB), lambda i: (0, 0)),     # w3
        pl.BlockSpec((1, EMB), lambda i: (0, 0)),        # b3
    ]
    out_specs = pl.BlockSpec((tile_b, EMB), lambda i: (i, 0))

    flops = 2 * B * (EMB * HID1 + HID1 * HID2 + HID2 * EMB)
    bytes_accessed = (
        B * EMB * x.dtype.itemsize                              # x
        + (EMB * HID1 + HID1 * HID2 + HID2 * EMB) * 2           # weights (bf16)
        + (HID1 + HID2 + EMB) * 4                               # biases (f32)
        + B * EMB * jnp.dtype(out_dtype).itemsize               # output
    )
    cost = pl.CostEstimate(flops=flops, transcendentals=B,
                           bytes_accessed=bytes_accessed)

    return pl.pallas_call(
        gst_kernel,
        out_shape=jax.ShapeDtypeStruct((B, EMB), out_dtype),
        grid_spec=pltpu.PrefetchScalarGridSpec(
            num_scalar_prefetch=0,
            grid=grid,
            in_specs=in_specs,
            out_specs=out_specs,
        ),
        compiler_params=pltpu.CompilerParams(
            # Harmless on single-TC chips; shards batch tiles across TCs on
            # v7x when num_batch_tiles > 1.  No vmem_limit override: the
            # kernel needs <2 MiB, well under every chip's default scope.
            dimension_semantics=("parallel",),
        ),
        cost_estimate=cost,
    )(x, w1, b1, w2, b2, w3, b3)


def reference(x, w1, b1, w2, b2, w3, b3):
    # Mirrors the kernel's precision (bf16 MXU inputs, f32 accumulation).
    bf = jnp.bfloat16
    h1 = jnp.maximum(
        jnp.dot(x.astype(bf), w1.astype(bf), preferred_element_type=jnp.float32) + b1, 0.0)
    h2 = jnp.maximum(
        jnp.dot(h1.astype(bf), w2.astype(bf), preferred_element_type=jnp.float32) + b2, 0.0)
    y = jnp.dot(h2.astype(bf), w3.astype(bf), preferred_element_type=jnp.float32) + b3
    n = jnp.sqrt(jnp.sum(y * y, axis=1, keepdims=True))
    return y / jnp.maximum(n, 1e-12)


if __name__ == "__main__":
    key = jax.random.PRNGKey(0)
    kx, k1, k2, k3, kb1, kb2, kb3 = jax.random.split(key, 7)

    # Deterministic synthetic parameters (Kaiming-ish scale).
    x = jax.random.normal(kx, (BATCH, EMB), dtype=jnp.float32)
    w1 = jax.random.normal(k1, (EMB, HID1), dtype=jnp.float32) * (1.0 / EMB) ** 0.5
    b1 = jax.random.normal(kb1, (1, HID1), dtype=jnp.float32) * 0.01
    w2 = jax.random.normal(k2, (HID1, HID2), dtype=jnp.float32) * (1.0 / HID1) ** 0.5
    b2 = jax.random.normal(kb2, (1, HID2), dtype=jnp.float32) * 0.01
    w3 = jax.random.normal(k3, (HID2, EMB), dtype=jnp.float32) * (1.0 / HID2) ** 0.5
    b3 = jax.random.normal(kb3, (1, EMB), dtype=jnp.float32) * 0.01

    # One-time init cast of the weights to bf16 (kept out of the per-call path).
    w1b, w2b, w3b = (w.astype(jnp.bfloat16) for w in (w1, w2, w3))

    out = gst_forward(x, w1b, b1, w2b, b2, w3b, b3)   # grid=(1,) default
    out = jax.block_until_ready(out)

    ref = reference(x, w1, b1, w2, b2, w3, b3)
    assert out.shape == (BATCH, EMB)
    max_err = float(jnp.max(jnp.abs(out - ref)))
    assert jnp.allclose(out, ref, atol=1e-3, rtol=1e-3), \
        f"mismatch vs reference (max abs err {max_err})"

    print("KERNEL_OK")
</pallas_src>

<mosaic_0001>
module attributes {stable_mosaic.version = 11 : i64} {
  func.func @gst_kernel(%arg0: i32, %arg1: memref<64x128xf32, #tpu.memory_space<vmem>>, %arg2: memref<128x256xbf16, #tpu.memory_space<vmem>>, %arg3: memref<1x256xf32, #tpu.memory_space<vmem>>, %arg4: memref<256x256xbf16, #tpu.memory_space<vmem>>, %arg5: memref<1x256xf32, #tpu.memory_space<vmem>>, %arg6: memref<256x128xbf16, #tpu.memory_space<vmem>>, %arg7: memref<1x128xf32, #tpu.memory_space<vmem>>, %arg8: memref<64x128xf32, #tpu.memory_space<vmem>>) attributes {dimension_semantics = [#tpu.dimension_semantics<parallel>], iteration_bounds = array<i64: 1>, scalar_prefetch = 0 : i64, scratch_operands = 0 : i64, tpu.core_type = #tpu.core_type<tc>, window_params = [{transform_indices = @transform_0, window_bounds = array<i64: 64, 128>}, {pipeline_mode = #tpu.pipeline_mode<synchronous>, transform_indices = @transform_1, window_bounds = array<i64: 128, 256>}, {pipeline_mode = #tpu.pipeline_mode<synchronous>, transform_indices = @transform_2, window_bounds = array<i64: 1, 256>}, {pipeline_mode = #tpu.pipeline_mode<synchronous>, transform_indices = @transform_3, window_bounds = array<i64: 256, 256>}, {pipeline_mode = #tpu.pipeline_mode<synchronous>, transform_indices = @transform_4, window_bounds = array<i64: 1, 256>}, {pipeline_mode = #tpu.pipeline_mode<synchronous>, transform_indices = @transform_5, window_bounds = array<i64: 256, 128>}, {pipeline_mode = #tpu.pipeline_mode<synchronous>, transform_indices = @transform_6, window_bounds = array<i64: 1, 128>}, {transform_indices = @transform_7, window_bounds = array<i64: 64, 128>}]} {
    %c0 = arith.constant 0 : index
    %c0_0 = arith.constant 0 : index
    %0 = vector.load %arg1[%c0, %c0_0] : memref<64x128xf32, #tpu.memory_space<vmem>>, vector<64x128xf32>
    %1 = arith.truncf %0 : vector<64x128xf32> to vector<64x128xbf16>
    %c0_1 = arith.constant 0 : index
    %c0_2 = arith.constant 0 : index
    %2 = vector.load %arg2[%c0_1, %c0_2] : memref<128x256xbf16, #tpu.memory_space<vmem>>, vector<128x256xbf16>
    %cst = arith.constant dense<0.000000e+00> : vector<64x256xf32>
    %3 = tpu.matmul %1, %2, %cst {dimension_numbers = #tpu.dot_dimension_numbers<[1], [0], [0], [1], [0, 0, 1, 1], [], []>} : vector<64x128xbf16>, vector<128x256xbf16>, vector<64x256xf32> -> vector<64x256xf32>
    %c0_3 = arith.constant 0 : index
    %c0_4 = arith.constant 0 : index
    %4 = vector.load %arg3[%c0_3, %c0_4] : memref<1x256xf32, #tpu.memory_space<vmem>>, vector<1x256xf32>
    %5 = vector.broadcast %4 : vector<1x256xf32> to vector<64x256xf32>
    %6 = arith.addf %3, %5 : vector<64x256xf32>
    %cst_5 = arith.constant 0.000000e+00 : f32
    %7 = vector.broadcast %cst_5 : f32 to vector<64x256xf32>
    %8 = arith.maximumf %6, %7 : vector<64x256xf32>
    %9 = arith.truncf %8 : vector<64x256xf32> to vector<64x256xbf16>
    %c0_6 = arith.constant 0 : index
    %c0_7 = arith.constant 0 : index
    %10 = vector.load %arg4[%c0_6, %c0_7] : memref<256x256xbf16, #tpu.memory_space<vmem>>, vector<256x256xbf16>
    %cst_8 = arith.constant dense<0.000000e+00> : vector<64x256xf32>
    %11 = tpu.matmul %9, %10, %cst_8 {dimension_numbers = #tpu.dot_dimension_numbers<[1], [0], [0], [1], [0, 0, 1, 1], [], []>} : vector<64x256xbf16>, vector<256x256xbf16>, vector<64x256xf32> -> vector<64x256xf32>
    %c0_9 = arith.constant 0 : index
    %c0_10 = arith.constant 0 : index
    %12 = vector.load %arg5[%c0_9, %c0_10] : memref<1x256xf32, #tpu.memory_space<vmem>>, vector<1x256xf32>
    %13 = vector.broadcast %12 : vector<1x256xf32> to vector<64x256xf32>
    %14 = arith.addf %11, %13 : vector<64x256xf32>
    %cst_11 = arith.constant 0.000000e+00 : f32
    %15 = vector.broadcast %cst_11 : f32 to vector<64x256xf32>
    %16 = arith.maximumf %14, %15 : vector<64x256xf32>
    %17 = arith.truncf %16 : vector<64x256xf32> to vector<64x256xbf16>
    %c0_12 = arith.constant 0 : index
    %c0_13 = arith.constant 0 : index
    %18 = vector.load %arg6[%c0_12, %c0_13] : memref<256x128xbf16, #tpu.memory_space<vmem>>, vector<256x128xbf16>
    %cst_14 = arith.constant dense<0.000000e+00> : vector<64x128xf32>
    %19 = tpu.matmul %17, %18, %cst_14 {dimension_numbers = #tpu.dot_dimension_numbers<[1], [0], [0], [1], [0, 0, 1, 1], [], []>} : vector<64x256xbf16>, vector<256x128xbf16>, vector<64x128xf32> -> vector<64x128xf32>
    %c0_15 = arith.constant 0 : index
    %c0_16 = arith.constant 0 : index
    %20 = vector.load %arg7[%c0_15, %c0_16] : memref<1x128xf32, #tpu.memory_space<vmem>>, vector<1x128xf32>
    %21 = vector.broadcast %20 : vector<1x128xf32> to vector<64x128xf32>
    %22 = arith.addf %19, %21 : vector<64x128xf32>
    %23 = arith.mulf %22, %22 : vector<64x128xf32>
    %cst_17 = arith.constant dense<0.000000e+00> : vector<64xf32>
    %24 = vector.multi_reduction <add>, %23, %cst_17 [1] : vector<64x128xf32> to vector<64xf32>
    %25 = vector.shape_cast %24 : vector<64xf32> to vector<64x1xf32>
    %cst_18 = arith.constant 1.000000e-24 : f32
    %26 = vector.broadcast %cst_18 : f32 to vector<64x1xf32>
    %27 = arith.maximumf %25, %26 : vector<64x1xf32>
    %28 = math.rsqrt %27 : vector<64x1xf32>
    %29 = vector.broadcast %28 : vector<64x1xf32> to vector<64x128xf32>
    %30 = arith.mulf %22, %29 : vector<64x128xf32>
    %c0_19 = arith.constant 0 : index
    %c0_20 = arith.constant 0 : index
    %31 = vector.load %arg8[%c0_19, %c0_20] : memref<64x128xf32, #tpu.memory_space<vmem>>, vector<64x128xf32>
    tpu.vector_store %arg8[%c0_19, %c0_20], %30 {strides = array<i32>} : memref<64x128xf32, #tpu.memory_space<vmem>>, vector<64x128xf32>,
    return
  }
  func.func @transform_0(%arg0: i32) -> (i32, i32) {
    %c0_i32 = arith.constant 0 : i32
    %c0_i32_0 = arith.constant 0 : i32
    return %arg0, %c0_i32 : i32, i32
  }
  func.func @transform_1(%arg0: i32) -> (i32, i32) {
    %c0_i32 = arith.constant 0 : i32
    %c0_i32_0 = arith.constant 0 : i32
    %c0_i32_1 = arith.constant 0 : i32
    return %c0_i32, %c0_i32_0 : i32, i32
  }
  func.func @transform_2(%arg0: i32) -> (i32, i32) {
    %c0_i32 = arith.constant 0 : i32
    %c0_i32_0 = arith.constant 0 : i32
    %c0_i32_1 = arith.constant 0 : i32
    return %c0_i32, %c0_i32_0 : i32, i32
  }
  func.func @transform_3(%arg0: i32) -> (i32, i32) {
    %c0_i32 = arith.constant 0 : i32
    %c0_i32_0 = arith.constant 0 : i32
    %c0_i32_1 = arith.constant 0 : i32
    return %c0_i32, %c0_i32_0 : i32, i32
  }
  func.func @transform_4(%arg0: i32) -> (i32, i32) {
    %c0_i32 = arith.constant 0 : i32
    %c0_i32_0 = arith.constant 0 : i32
    %c0_i32_1 = arith.constant 0 : i32
    return %c0_i32, %c0_i32_0 : i32, i32
  }
  func.func @transform_5(%arg0: i32) -> (i32, i32) {
    %c0_i32 = arith.constant 0 : i32
    %c0_i32_0 = arith.constant 0 : i32
    %c0_i32_1 = arith.constant 0 : i32
    return %c0_i32, %c0_i32_0 : i32, i32
  }
  func.func @transform_6(%arg0: i32) -> (i32, i32) {
    %c0_i32 = arith.constant 0 : i32
    %c0_i32_0 = arith.constant 0 : i32
    %c0_i32_1 = arith.constant 0 : i32
    return %c0_i32, %c0_i32_0 : i32, i32
  }
  func.func @transform_7(%arg0: i32) -> (i32, i32) {
    %c0_i32 = arith.constant 0 : i32
    %c0_i32_0 = arith.constant 0 : i32
    return %arg0, %c0_i32 : i32, i32
  }
}

</mosaic_0001>

<bundles_post_ra>
// kernel: tpu_custom_call.1
= control target key start
LH: loop header
LB: loop body
LE: loop exit
PB: predicated region body
PF: predicated region fallthrough
CT: control target
= control target key end

     0   :  { %12 = vsyncpa [#allocation3], 0  ;;  %s1374_s0 = inlined_call_operand.hbm [shape: f32[64,128], index: 0, kind: input, shape index: {}]   ;;  %s1375_s1 = inlined_call_operand.hbm [shape: bf16[128,256], index: 1, kind: input, shape index: {}]   ;;  %s1376_s2 = inlined_call_operand.vmem [shape: f32[1,256], index: 2, kind: input, shape index: {}]   ;;  %s1377_s3 = inlined_call_operand.hbm [shape: bf16[256,256], index: 3, kind: input, shape index: {}]   ;;  %s1378_s4 = inlined_call_operand.vmem [shape: f32[1,256], index: 4, kind: input, shape index: {}]   ;;  %s1379_s5 = inlined_call_operand.hbm [shape: bf16[256,128], index: 5, kind: input, shape index: {}]   ;;  %s1380_s6 = inlined_call_operand.vmem [shape: f32[1,128], index: 6, kind: input, shape index: {}]   ;;  %s1381_s7 = inlined_call_operand.hbm [shape: f32[64,128], index: 7, kind: output, shape index: {}]  }
   0x1   :  { %13 = vsyncpa [#allocation6], 0 }
   0x2   :  { %14 = vsyncpa [#allocation9], 0 }
   0x3   :  { %15 = vsyncpa [#allocation4], 0  ;;  %s1213_s24 = smov [#allocation5]   ;;  %s1214_s26 = smov [#allocation2]  }
   0x4   :  { %s33_s25 = sshll.u32 %s1213_s24, 4  ;;  %s21_s27 = sshll.u32 %s1214_s26, 4  ;;  %s34_s25 = int_to_ptr.vmem [resolvable:$true] %s33_s25  ;;  %s1263_s27 = int_to_ptr.vmem [resolvable:$true] %s21_s27 }
   0x5   :  { %s1095_s30 = scalar_lea.hbm %s1375_s1, 2048 }
   0x6   :  { %p1096_p0 = scmp.ne.s32.totalorder %s1375_s1, %s1095_s30  ;;  %p1099_p1 = scmp.lt.u32.totalorder %s1095_s30, %s1375_s1 }
   0x8   :  { %p1101_p2 = pnand %p1099_p1, %p1096_p0 }
   0xa   :  { %1104 = shalt.err (!%p1101_p2)
}
   0xb   :  { %s1105_s12 = scalar_lea.vmem %s34_s25, 2048  ;;  %p1110_p4 = scmp.lt.s32.totalorder %s34_s25, %s34_s25 }
   0xc   :  { %p1106_p3 = scmp.ne.s32.totalorder %s34_s25, %s1105_s12  ;;  %p1111_p5 = scmp.lt.s32.totalorder %s1105_s12, %s1105_s12 }
   0xe   :  { %p1112_p6 = por %p1111_p5, %p1110_p4 }
  0x10   :  { %p1113_p7 = pnand %p1112_p6, %p1106_p3 }
  0x12   :  { %1116 = shalt.err (!%p1113_p7)
}
  0x13   :  { %s1215_s13 = smov 128   ;;  %s1216_s14 = smov 8  }
  0x14   :  { %39 = dma.hbm_to_vmem [thread:$0]  %s1375_s1, 2048, %s34_s25, [#allocation6], %s1215_s13, %s1215_s13, %s1216_s14  }
  0x15   :  { %s1117_s19 = scalar_lea.hbm %s1374_s0, 1024 }
  0x16   :  { %p1118_p8 = scmp.ne.s32.totalorder %s1374_s0, %s1117_s19  ;;  %p1121_p9 = scmp.lt.u32.totalorder %s1117_s19, %s1374_s0 }
  0x18   :  { %p1123_p10 = pnand %p1121_p9, %p1118_p8 }
  0x1a   :  { %1126 = shalt.err (!%p1123_p10)
}
  0x1b   :  { %s1127_s24 = scalar_lea.vmem %s1263_s27, 1024  ;;  %p1132_p12 = scmp.lt.s32.totalorder %s1263_s27, %s1263_s27 }
  0x1c   :  { %p1128_p11 = scmp.ne.s32.totalorder %s1263_s27, %s1127_s24  ;;  %p1133_p13 = scmp.lt.s32.totalorder %s1127_s24, %s1127_s24 }
  0x1e   :  { %p1134_p0 = por %p1133_p13, %p1132_p12 }
  0x20   :  { %p1135_p1 = pnand %p1134_p0, %p1128_p11 }
  0x22   :  { %1138 = shalt.err (!%p1135_p1)
}
  0x23   :  { %27 = dma.hbm_to_vmem [thread:$0]  %s1374_s0, 1024, %s1263_s27, [#allocation3], %s1215_s13, %s1215_s13, %s1216_s14  }
  0x24   :  { %s1217_s26 = smov [#allocation7]   ;;  %s1218_s29 = smov [#allocation8]  }
  0x25   :  { %s47_s28 = sshll.u32 %s1217_s26, 4  ;;  %s61_s30 = sshll.u32 %s1218_s29, 4  ;;  %s48_s28 = int_to_ptr.vmem [resolvable:$true] %s47_s28  ;;  %s1300_s30 = int_to_ptr.vmem [resolvable:$true] %s61_s30 }
  0x26   :  { %s1139_s10 = scalar_lea.hbm %s1377_s3, 4096 }
  0x27   :  { %p1140_p2 = scmp.ne.s32.totalorder %s1377_s3, %s1139_s10  ;;  %p1143_p3 = scmp.lt.u32.totalorder %s1139_s10, %s1377_s3 }
  0x29   :  { %p1145_p4 = pnand %p1143_p3, %p1140_p2 }
  0x2b   :  { %1148 = shalt.err (!%p1145_p4)
}
  0x2c   :  { %s1149_s0 = scalar_lea.vmem %s48_s28, 4096  ;;  %p1154_p6 = scmp.lt.s32.totalorder %s48_s28, %s48_s28 }
  0x2d   :  { %p1150_p5 = scmp.ne.s32.totalorder %s48_s28, %s1149_s0  ;;  %p1155_p7 = scmp.lt.s32.totalorder %s1149_s0, %s1149_s0 }
  0x2f   :  { %p1156_p8 = por %p1155_p7, %p1154_p6 }
  0x31   :  { %p1157_p9 = pnand %p1156_p8, %p1150_p5 }
  0x33   :  { %1160 = shalt.err (!%p1157_p9)
}
  0x34   :  { %53 = dma.hbm_to_vmem [thread:$0]  %s1377_s3, 4096, %s48_s28, [#allocation6], %s1215_s13, %s1215_s13, %s1216_s14  }
  0x35   :  { %s1161_s20 = scalar_lea.hbm %s1379_s5, 2048 }
  0x36   :  { %p1162_p10 = scmp.ne.s32.totalorder %s1379_s5, %s1161_s20  ;;  %p1165_p11 = scmp.lt.u32.totalorder %s1161_s20, %s1379_s5 }
  0x38   :  { %p1167_p12 = pnand %p1165_p11, %p1162_p10 }
  0x3a   :  { %1170 = shalt.err (!%p1167_p12)
}
  0x3b   :  { %s1171_s1 = scalar_lea.vmem %s1300_s30, 2048  ;;  %p1176_p0 = scmp.lt.s32.totalorder %s1300_s30, %s1300_s30 }
  0x3c   :  { %p1172_p13 = scmp.ne.s32.totalorder %s1300_s30, %s1171_s1  ;;  %p1177_p1 = scmp.lt.s32.totalorder %s1171_s1, %s1171_s1 }
  0x3e   :  { %p1178_p2 = por %p1177_p1, %p1176_p0 }
  0x40   :  { %p1179_p3 = pnand %p1178_p2, %p1172_p13 }
  0x42   :  { %1182 = shalt.err (!%p1179_p3)
}
  0x43   :  { %s1219_s3 = smov 64   ;;  %s1220_s25 = smov 4  }
  0x44   :  { %67 = dma.hbm_to_vmem [thread:$0]  %s1379_s5, 2048, %s1300_s30, [#allocation9], %s1219_s3, %s1219_s3, %s1220_s25  }
  0x45   :  { %1205 = dma.done.wait [#allocation3], 1024  }
  0x46   :  { %1206 = vsyncadd [#allocation3], 4294966272 }
  0x47   :  { %1207 = dma.done.wait [#allocation6], 6144  }
  0x48   :  { %1208 = vsyncadd [#allocation6], 4294961152 }
  0x49   :  { %1209 = dma.done.wait [#allocation9], 2048  }
  0x4a   :  { %1210 = vsyncadd [#allocation9], 4294965248  ;;  %v1221_v0 = vmov 0   ;;  %v991_v1 = vld [vmem:[#allocation5 + $0x4] ss:$8 sps:$4 sm:$0xff]   ;;  %v85_v33 = vld [vmem:[#allocation2 + $0x10] sm:$0xff] }
  0x4b   :  { %235 = vmatprep.mubr.bf16.mxu0 %v1221_v0  ;;  %v993_v2 = vld [vmem:[#allocation5] ss:$8 sps:$4 sm:$0xff]   ;;  %203 = vmatprep.subr.bf16.mxu0 %v991_v1  ;;  %v994_v3 = vld [vmem:[#allocation5 + $0x14] ss:$8 sps:$4 sm:$0xff]   ;;  %v996_v4 = vld [vmem:[#allocation5 + $0x10] ss:$8 sps:$4 sm:$0xff]  }
  0x4c   :  { %204 = vmatpush1.bf16.msra.mxu0 %v993_v2  ;;  %v997_v5 = vld [vmem:[#allocation5 + $0x24] ss:$8 sps:$4 sm:$0xff]   ;;  %v999_v6 = vld [vmem:[#allocation5 + $0x20] ss:$8 sps:$4 sm:$0xff]   ;;  %v1000_v7 = vld [vmem:[#allocation5 + $0x34] ss:$8 sps:$4 sm:$0xff]  }
  0x4d   :  { %205 = vmatprep.subr.bf16.mxu0 %v994_v3  ;;  %v1002_v8 = vld [vmem:[#allocation5 + $0x30] ss:$8 sps:$4 sm:$0xff]   ;;  %v1003_v9 = vld [vmem:[#allocation5 + $0x44] ss:$8 sps:$4 sm:$0xff]   ;;  %v1017_v11 = vld [vmem:[#allocation7] ss:$8 sps:$4 sm:$0xff]  }
  0x4e   :  { %v1015_v10 = vld [vmem:[#allocation7 + $0x4] ss:$8 sps:$4 sm:$0xff]   ;;  %v1005_v12 = vld [vmem:[#allocation5 + $0x40] ss:$8 sps:$4 sm:$0xff]   ;;  %v1018_v13 = vld [vmem:[#allocation7 + $0x14] ss:$8 sps:$4 sm:$0xff]  }
  0x4f   :  { %v1006_v14 = vld [vmem:[#allocation5 + $0x54] ss:$8 sps:$4 sm:$0xff]   ;;  %504 = vmatprep.subr.bf16.mxu1 %v1015_v10  ;;  %v1020_v15 = vld [vmem:[#allocation7 + $0x10] ss:$8 sps:$4 sm:$0xff]   ;;  %v1021_v16 = vld [vmem:[#allocation7 + $0x24] ss:$8 sps:$4 sm:$0xff]  }
  0x50   :  { %206 = vmatpush1.bf16.msra.mxu0 %v996_v4  ;;  %505 = vmatpush1.bf16.msra.mxu1 %v1017_v11  ;;  %v1008_v17 = vld [vmem:[#allocation5 + $0x50] ss:$8 sps:$4 sm:$0xff]   ;;  %v1009_v18 = vld [vmem:[#allocation5 + $0x64] ss:$8 sps:$4 sm:$0xff]   ;;  %v1023_v19 = vld [vmem:[#allocation7 + $0x20] ss:$8 sps:$4 sm:$0xff]  }
  0x51   :  { %207 = vmatprep.subr.bf16.mxu0 %v997_v5  ;;  %506 = vmatprep.subr.bf16.mxu1 %v1018_v13  ;;  %v1024_v20 = vld [vmem:[#allocation7 + $0x34] ss:$8 sps:$4 sm:$0xff]   ;;  %v1011_v21 = vld [vmem:[#allocation5 + $0x60] ss:$8 sps:$4 sm:$0xff]   ;;  %v1026_v23 = vld [vmem:[#allocation7 + $0x30] ss:$8 sps:$4 sm:$0xff]  }
  0x52   :  { %v1012_v22 = vld [vmem:[#allocation5 + $0x74] ss:$8 sps:$4 sm:$0xff]   ;;  %v1014_v24 = vld [vmem:[#allocation5 + $0x70] ss:$8 sps:$4 sm:$0xff]   ;;  %v1027_v25 = vld [vmem:[#allocation7 + $0x44] ss:$8 sps:$4 sm:$0xff]  }
  0x53   :  { %v83_v26 = vld [vmem:[#allocation2] sm:$0xff]  ;;  %v84_v27 = vld [vmem:[#allocation2 + $0x8] sm:$0xff]  ;;  %v1030_v30 = vld [vmem:[#allocation7 + $0x54] ss:$8 sps:$4 sm:$0xff]  }
  0x54   :  { %208 = vmatpush1.bf16.msra.mxu0 %v999_v6  ;;  %507 = vmatpush1.bf16.msra.mxu1 %v1020_v15  ;;  %v1029_v28 = vld [vmem:[#allocation7 + $0x40] ss:$8 sps:$4 sm:$0xff]   ;;  %v91_v29 = vpack.c.bf16 %v84_v27, %v83_v26  ;;  %v1032_v31 = vld [vmem:[#allocation7 + $0x50] ss:$8 sps:$4 sm:$0xff]   ;;  %v1033_v32 = vld [vmem:[#allocation7 + $0x64] ss:$8 sps:$4 sm:$0xff]  }
  0x55   :  { %209 = vmatprep.subr.bf16.mxu0 %v1000_v7  ;;  %508 = vmatprep.subr.bf16.mxu1 %v1021_v16  ;;  %v86_v34 = vld [vmem:[#allocation2 + $0x18] sm:$0xff]  ;;  %v1035_v35 = vld [vmem:[#allocation7 + $0x60] ss:$8 sps:$4 sm:$0xff]   ;;  %v1039_v39 = vld [vmem:[#allocation7 + $0x84] ss:$8 sps:$4 sm:$0xff]  }
  0x56   :  { %v1036_v36 = vld [vmem:[#allocation7 + $0x74] ss:$8 sps:$4 sm:$0xff]   ;;  %v92_v37 = vpack.c.bf16 %v86_v34, %v85_v33  ;;  %v1038_v38 = vld [vmem:[#allocation7 + $0x70] ss:$8 sps:$4 sm:$0xff]   ;;  %v87_v40 = vld [vmem:[#allocation2 + $0x20] sm:$0xff] }
  0x57   :  { %v88_v41 = vld [vmem:[#allocation2 + $0x28] sm:$0xff]  ;;  %v1042_v44 = vld [vmem:[#allocation7 + $0x94] ss:$8 sps:$4 sm:$0xff]   ;;  %v1044_v45 = vld [vmem:[#allocation7 + $0x90] ss:$8 sps:$4 sm:$0xff]  }
  0x58   :  { %210 = vmatpush1.bf16.msra.mxu0 %v1002_v8  ;;  %509 = vmatpush1.bf16.msra.mxu1 %v1023_v19  ;;  %v1041_v42 = vld [vmem:[#allocation7 + $0x80] ss:$8 sps:$4 sm:$0xff]   ;;  %v93_v43 = vpack.c.bf16 %v88_v41, %v87_v40  ;;  %v1045_v46 = vld [vmem:[#allocation7 + $0xa4] ss:$8 sps:$4 sm:$0xff]   ;;  %v89_v47 = vld [vmem:[#allocation2 + $0x30] sm:$0xff] }
  0x59   :  { %211 = vmatprep.subr.bf16.mxu0 %v1003_v9  ;;  %510 = vmatprep.subr.bf16.mxu1 %v1024_v20  ;;  %v90_v48 = vld [vmem:[#allocation2 + $0x38] sm:$0xff]  ;;  %v1047_v49 = vld [vmem:[#allocation7 + $0xa0] ss:$8 sps:$4 sm:$0xff]   ;;  %v1051_v53 = vld [vmem:[#allocation7 + $0xc4] ss:$8 sps:$4 sm:$0xff]   ;;  %v113_v9 = vlaneseq }
  0x5a   :  { %v94_v50 = vpack.c.bf16 %v90_v48, %v89_v47  ;;  %v1048_v51 = vld [vmem:[#allocation7 + $0xb4] ss:$8 sps:$4 sm:$0xff]   ;;  %v1050_v52 = vld [vmem:[#allocation7 + $0xb0] ss:$8 sps:$4 sm:$0xff]   ;;  %v1053_v54 = vld [vmem:[#allocation7 + $0xc0] ss:$8 sps:$4 sm:$0xff]  }
  0x5b   :  { %v1054_v55 = vld [vmem:[#allocation7 + $0xd4] ss:$8 sps:$4 sm:$0xff]   ;;  %v1056_v56 = vld [vmem:[#allocation7 + $0xd0] ss:$8 sps:$4 sm:$0xff]   ;;  %v1057_v57 = vld [vmem:[#allocation7 + $0xe4] ss:$8 sps:$4 sm:$0xff]  }
  0x5c   :  { %212 = vmatpush1.bf16.msra.mxu0 %v1005_v12  ;;  %511 = vmatpush1.bf16.msra.mxu1 %v1026_v23  ;;  %v1059_v58 = vld [vmem:[#allocation7 + $0xe0] ss:$8 sps:$4 sm:$0xff]   ;;  %v1060_v59 = vld [vmem:[#allocation7 + $0xf4] ss:$8 sps:$4 sm:$0xff]   ;;  %v1062_v60 = vld [vmem:[#allocation7 + $0xf0] ss:$8 sps:$4 sm:$0xff]  }
  0x5d   :  { %213 = vmatprep.subr.bf16.mxu0 %v1006_v14  ;;  %512 = vmatprep.subr.bf16.mxu1 %v1027_v25  ;;  %v1063_v61 = vld [vmem:[#allocation8 + $0x40] sm:$0xff]   ;;  %v1065_v63 = vld [vmem:[#allocation8 + $0x48] sm:$0xff]   ;;  %v1067_v1 = vld [vmem:[#allocation8 + $0x50] sm:$0xff]   ;;  %v1338_v10 = vshrl.u32 %v113_v9, 7 }
  0x5e   :  { %v1064_v62 = vld [vmem:[#allocation8] sm:$0xff]   ;;  %v1068_v2 = vld [vmem:[#allocation8 + $0x10] sm:$0xff]   ;;  %v1069_v3 = vld [vmem:[#allocation8 + $0x58] sm:$0xff]  }
  0x5f   :  { %v1070_v4 = vld [vmem:[#allocation8 + $0x18] sm:$0xff]   ;;  %v1071_v5 = vld [vmem:[#allocation8 + $0x60] sm:$0xff]   ;;  %v1073_v7 = vld [vmem:[#allocation8 + $0x68] sm:$0xff]   ;;  %v115_v11 = vsub.s32 0, %v1338_v10  ;;  %v119_v13 = vsub.s32 1, %v1338_v10 }
  0x60   :  { %214 = vmatpush1.bf16.msra.mxu0 %v1008_v17  ;;  %513 = vmatpush1.bf16.msra.mxu1 %v1029_v28  ;;  %v1072_v6 = vld [vmem:[#allocation8 + $0x20] sm:$0xff]   ;;  %v1074_v8 = vld [vmem:[#allocation8 + $0x28] sm:$0xff]   ;;  %v1076_v9 = vld [vmem:[#allocation8 + $0x30] sm:$0xff]  }
  0x61   :  { %215 = vmatprep.subr.bf16.mxu0 %v1009_v18  ;;  %514 = vmatprep.subr.bf16.mxu1 %v1030_v30  ;;  %v111_v12 = vld [vmem:[%s1376_s2] sm:$0x3] }
  0x62   :  { %v116_v14 = vrot.slane %v111_v12, %v115_v11  ;;  %v120_v15 = vrot.slane %v111_v12, %v119_v13  ;;  %v1077_v12 = vld [vmem:[#allocation8 + $0x78] sm:$0xff]  }
  0x64   :  { %216 = vmatpush1.bf16.msra.mxu0 %v1011_v21  ;;  %515 = vmatpush1.bf16.msra.mxu1 %v1032_v31 }
  0x65   :  { %217 = vmatprep.subr.bf16.mxu0 %v1012_v22  ;;  %516 = vmatprep.subr.bf16.mxu1 %v1033_v32 }
  0x68   :  { %218 = vmatpush1.bf16.msra.mxu0 %v1014_v24  ;;  %517 = vmatpush1.bf16.msra.mxu1 %v1035_v35 }
  0x69   :  { %518 = vmatprep.subr.bf16.mxu1 %v1036_v36  ;;  %941 = vmatprep.subr.bf16.mxu0 %v1063_v61 }
  0x6b   :  { %236 = vmatmul.mubr.bf16.vlgmr.msra.gmra.mrb[0].mxu0 %v91_v29 }
  0x6c   :  { %245 = vmatprep.mubr.bf16.mxu0 %v1221_v0  ;;  %519 = vmatpush1.bf16.msra.mxu1 %v1038_v38 }
  0x6d   :  { %520 = vmatprep.subr.bf16.mxu1 %v1039_v39  ;;  %942 = vmatpush3.bf16.msra.mxu0 %v1064_v62 }
  0x6e   :  { %943 = vmatprep.subr.bf16.mxu0 %v1065_v63 }
  0x70   :  { %521 = vmatpush1.bf16.msra.mxu1 %v1041_v42 }
  0x71   :  { %522 = vmatprep.subr.bf16.mxu1 %v1042_v44 }
  0x73   :  { %246 = vmatmul.mubr.bf16.gmra.mrb[4].mxu0 %v92_v37 }
  0x74   :  { %255 = vmatprep.mubr.bf16.mxu0 %v1221_v0  ;;  %523 = vmatpush1.bf16.msra.mxu1 %v1044_v45 }
  0x75   :  { %524 = vmatprep.subr.bf16.mxu1 %v1045_v46 }
  0x78   :  { %525 = vmatpush1.bf16.msra.mxu1 %v1047_v49 }
  0x79   :  { %526 = vmatprep.subr.bf16.mxu1 %v1048_v51 }
  0x7b   :  { %256 = vmatmul.mubr.bf16.gmra.mrb[8].mxu0 %v93_v43 }
  0x7c   :  { %265 = vmatprep.mubr.bf16.mxu0 %v1221_v0  ;;  %527 = vmatpush1.bf16.msra.mxu1 %v1050_v52  ;;  %v1066_v0 = vld [vmem:[#allocation8 + $0x8] sm:$0xff]  }
  0x7d   :  { %528 = vmatprep.subr.bf16.mxu1 %v1051_v53  ;;  %944 = vmatpush3.bf16.msra.mxu0 %v1066_v0 }
  0x7e   :  { %945 = vmatprep.subr.bf16.mxu0 %v1067_v1 }
  0x80   :  { %529 = vmatpush1.bf16.msra.mxu1 %v1053_v54 }
  0x81   :  { %530 = vmatprep.subr.bf16.mxu1 %v1054_v55  ;;  %946 = vmatpush3.bf16.msra.mxu0 %v1068_v2 }
  0x82   :  { %947 = vmatprep.subr.bf16.mxu0 %v1069_v3 }
  0x83   :  { %266 = vmatmul.mubr.bf16.gmra.mrb[12].mxu0 %v94_v50 }
  0x84   :  { %531 = vmatpush1.bf16.msra.mxu1 %v1056_v56 }
  0x85   :  { %532 = vmatprep.subr.bf16.mxu1 %v1057_v57  ;;  %948 = vmatpush3.bf16.msra.mxu0 %v1070_v4 }
  0x86   :  { %949 = vmatprep.subr.bf16.mxu0 %v1071_v5 }
  0x88   :  { %533 = vmatpush1.bf16.msra.mxu1 %v1059_v58 }
  0x89   :  { %534 = vmatprep.subr.bf16.mxu1 %v1060_v59  ;;  %950 = vmatpush3.bf16.msra.mxu0 %v1072_v6 }
  0x8a   :  { %951 = vmatprep.subr.bf16.mxu0 %v1073_v7 }
  0x8c   :  { %535 = vmatpush1.bf16.msra.mxu1 %v1062_v60 }
  0x8d   :  { %952 = vmatpush3.bf16.msra.mxu0 %v1074_v8  ;;  %v1075_v8 = vld [vmem:[#allocation8 + $0x70] sm:$0xff]  }
  0x8e   :  { %953 = vmatprep.subr.bf16.mxu0 %v1075_v8 }
  0x91   :  { %954 = vmatpush3.bf16.msra.mxu0 %v1076_v9  ;;  %v924_v9 = vld [vmem:[%s1380_s6] ss:$0 sm:$0xff]  ;;  %s1222_s6 = smov [#allocation10]  }
  0x92   :  { %955 = vmatprep.subr.bf16.mxu0 %v1077_v12  ;;  %s862_s9 = sshll.u32 %s1222_s6, 4  ;;  %s863_s9 = int_to_ptr.vmem [resolvable:$true] %s862_s9 }
  0x93   :  { %s1183_s10 = scalar_lea.vmem %s863_s9, 1024  ;;  %p1188_p5 = scmp.lt.s32.totalorder %s863_s9, %s863_s9 }
  0x94   :  { %p1184_p4 = scmp.ne.s32.totalorder %s863_s9, %s1183_s10  ;;  %p1189_p6 = scmp.lt.s32.totalorder %s1183_s10, %s1183_s10 }
  0x96   :  { %p1190_p7 = por %p1189_p6, %p1188_p5 }
  0x98   :  { %p1191_p8 = pnand %p1190_p7, %p1184_p4 }
 0x13e   :  { %v237_v16 = vpop.f32.mrb[0].mxu0 }
 0x13f   :  { %v238_v17 = vadd.f32 %v237_v16, %v116_v14  ;;  %v239_v18 = vpop.f32.mrb[1].mxu0  ;;  %v1078_v16 = vld [vmem:[#allocation8 + $0x38] sm:$0xff]  }
 0x140   :  { %v240_v19 = vadd.f32 %v239_v18, %v120_v15  ;;  %v241_v20 = vpop.f32.mrb[2].mxu0  ;;  %956 = vmatpush3.bf16.msra.mxu0 %v1078_v16 }
 0x141   :  { %v242_v21 = vadd.f32 %v241_v20, %v116_v14  ;;  %v243_v22 = vpop.f32.mrb[3].mxu0  ;;  %v276_v24 = vmax.f32 %v238_v17, 0.0 }
 0x142   :  { %v244_v23 = vadd.f32 %v243_v22, %v120_v15  ;;  %v277_v26 = vmax.f32 %v240_v19, 0.0 }
 0x143   :  { %v278_v25 = vmax.f32 %v242_v21, 0.0 }
 0x144   :  { %v279_v27 = vmax.f32 %v244_v23, 0.0 }
 0x145   :  { %v292_v28 = vpack.c.bf16 %v278_v25, %v276_v24 }
 0x146   :  { %v247_v29 = vpop.f32.mrb[4].mxu0  ;;  %v293_v30 = vpack.c.bf16 %v279_v27, %v277_v26 }
 0x147   :  { %v248_v31 = vadd.f32 %v247_v29, %v116_v14  ;;  %v249_v32 = vpop.f32.mrb[5].mxu0 }
 0x148   :  { %v250_v33 = vadd.f32 %v249_v32, %v120_v15  ;;  %v251_v34 = vpop.f32.mrb[6].mxu0  ;;  %536 = vmatprep.mubr.bf16.mxu1 %v293_v30 }
 0x149   :  { %v252_v35 = vadd.f32 %v251_v34, %v116_v14  ;;  %v253_v36 = vpop.f32.mrb[7].mxu0  ;;  %537 = vmatmul.mubr.bf16.vlgmr.msra.gmra.mrb[0].mxu1 %v292_v28  ;;  %v280_v38 = vmax.f32 %v248_v31, 0.0 }
 0x14a   :  { %v254_v37 = vadd.f32 %v253_v36, %v120_v15  ;;  %v281_v40 = vmax.f32 %v250_v33, 0.0 }
 0x14b   :  { %v282_v39 = vmax.f32 %v252_v35, 0.0 }
 0x14c   :  { %v283_v41 = vmax.f32 %v254_v37, 0.0 }
 0x14d   :  { %v294_v42 = vpack.c.bf16 %v282_v39, %v280_v38 }
 0x14e   :  { %v295_v43 = vpack.c.bf16 %v283_v41, %v281_v40  ;;  %v257_v44 = vpop.f32.mrb[8].mxu0 }
 0x14f   :  { %v258_v45 = vadd.f32 %v257_v44, %v116_v14  ;;  %v259_v46 = vpop.f32.mrb[9].mxu0 }
 0x150   :  { %v260_v47 = vadd.f32 %v259_v46, %v120_v15  ;;  %v261_v48 = vpop.f32.mrb[10].mxu0  ;;  %546 = vmatprep.mubr.bf16.mxu1 %v295_v43 }
 0x151   :  { %v262_v49 = vadd.f32 %v261_v48, %v116_v14  ;;  %v263_v50 = vpop.f32.mrb[11].mxu0  ;;  %547 = vmatmul.mubr.bf16.gmra.mrb[4].mxu1 %v294_v42  ;;  %v284_v52 = vmax.f32 %v258_v45, 0.0 }
 0x152   :  { %v264_v51 = vadd.f32 %v263_v50, %v120_v15  ;;  %v285_v54 = vmax.f32 %v260_v47, 0.0 }
 0x153   :  { %v286_v53 = vmax.f32 %v262_v49, 0.0 }
 0x154   :  { %v287_v55 = vmax.f32 %v264_v51, 0.0 }
 0x155   :  { %v296_v56 = vpack.c.bf16 %v286_v53, %v284_v52 }
 0x156   :  { %v297_v57 = vpack.c.bf16 %v287_v55, %v285_v54  ;;  %v267_v58 = vpop.f32.mrb[12].mxu0 }
 0x157   :  { %v268_v59 = vadd.f32 %v267_v58, %v116_v14  ;;  %v269_v60 = vpop.f32.mrb[13].mxu0 }
 0x158   :  { %v270_v61 = vadd.f32 %v269_v60, %v120_v15  ;;  %v271_v62 = vpop.f32.mrb[14].mxu0  ;;  %556 = vmatprep.mubr.bf16.mxu1 %v297_v57 }
 0x159   :  { %v272_v63 = vadd.f32 %v271_v62, %v116_v14  ;;  %v273_v0 = vpop.f32.mrb[15].mxu0  ;;  %557 = vmatmul.mubr.bf16.gmra.mrb[8].mxu1 %v296_v56  ;;  %v288_v2 = vmax.f32 %v268_v59, 0.0  ;;  %v332_v14 = vld [vmem:[%s1378_s4] sm:$0x3] }
 0x15a   :  { %v274_v1 = vadd.f32 %v273_v0, %v120_v15  ;;  %v289_v4 = vmax.f32 %v270_v61, 0.0  ;;  %v337_v15 = vrot.slane %v332_v14, %v115_v11  ;;  %v341_v17 = vrot.slane %v332_v14, %v119_v13 }
 0x15b   :  { %v290_v3 = vmax.f32 %v272_v63, 0.0 }
 0x15c   :  { %v291_v5 = vmax.f32 %v274_v1, 0.0 }
 0x15d   :  { %v298_v6 = vpack.c.bf16 %v290_v3, %v288_v2 }
 0x15e   :  { %v299_v7 = vpack.c.bf16 %v291_v5, %v289_v4 }
 0x160   :  { %566 = vmatprep.mubr.bf16.mxu1 %v299_v7 }
 0x161   :  { %567 = vmatmul.mubr.bf16.gmra.mrb[12].mxu1 %v298_v6 }
 0x21c   :  { %v538_v18 = vpop.f32.mrb[0].mxu1 }
 0x21d   :  { %v539_v19 = vadd.f32 %v538_v18, %v337_v15  ;;  %v540_v20 = vpop.f32.mrb[1].mxu1 }
 0x21e   :  { %v541_v21 = vadd.f32 %v540_v20, %v341_v17  ;;  %v542_v22 = vpop.f32.mrb[2].mxu1 }
 0x21f   :  { %v543_v23 = vadd.f32 %v542_v22, %v337_v15  ;;  %v544_v24 = vpop.f32.mrb[3].mxu1  ;;  %v577_v26 = vmax.f32 %v539_v19, 0.0 }
 0x220   :  { %v545_v25 = vadd.f32 %v544_v24, %v341_v17  ;;  %v578_v28 = vmax.f32 %v541_v21, 0.0 }
 0x221   :  { %v579_v27 = vmax.f32 %v543_v23, 0.0 }
 0x222   :  { %v580_v29 = vmax.f32 %v545_v25, 0.0 }
 0x223   :  { %v593_v30 = vpack.c.bf16 %v579_v27, %v577_v26 }
 0x224   :  { %v594_v31 = vpack.c.bf16 %v580_v29, %v578_v28  ;;  %v548_v32 = vpop.f32.mrb[4].mxu1 }
 0x225   :  { %v549_v33 = vadd.f32 %v548_v32, %v337_v15  ;;  %v550_v11 = vpop.f32.mrb[5].mxu1 }
 0x226   :  { %v551_v34 = vadd.f32 %v550_v11, %v341_v17  ;;  %v552_v10 = vpop.f32.mrb[6].mxu1  ;;  %768 = vmatprep.mubr.bf16.mxu0 %v594_v31 }
 0x227   :  { %v553_v13 = vadd.f32 %v552_v10, %v337_v15  ;;  %v554_v35 = vpop.f32.mrb[7].mxu1  ;;  %769 = vmatmul.mubr.bf16.vlgmr.msra.gmra.mrb[16].mxu0 %v593_v30  ;;  %v581_v37 = vmax.f32 %v549_v33, 0.0 }
 0x228   :  { %v555_v36 = vadd.f32 %v554_v35, %v341_v17  ;;  %v582_v39 = vmax.f32 %v551_v34, 0.0 }
 0x229   :  { %v583_v38 = vmax.f32 %v553_v13, 0.0 }
 0x22a   :  { %v584_v40 = vmax.f32 %v555_v36, 0.0 }
 0x22b   :  { %v595_v41 = vpack.c.bf16 %v583_v38, %v581_v37 }
 0x22c   :  { %v596_v42 = vpack.c.bf16 %v584_v40, %v582_v39  ;;  %v558_v43 = vpop.f32.mrb[8].mxu1 }
 0x22d   :  { %v559_v44 = vadd.f32 %v558_v43, %v337_v15  ;;  %v560_v45 = vpop.f32.mrb[9].mxu1 }
 0x22e   :  { %v561_v46 = vadd.f32 %v560_v45, %v341_v17  ;;  %v562_v47 = vpop.f32.mrb[10].mxu1  ;;  %776 = vmatprep.mubr.bf16.mxu0 %v596_v42 }
 0x22f   :  { %v563_v48 = vadd.f32 %v562_v47, %v337_v15  ;;  %v564_v49 = vpop.f32.mrb[11].mxu1  ;;  %777 = vmatmul.mubr.bf16.gmra.mrb[20].mxu0 %v595_v41  ;;  %v585_v51 = vmax.f32 %v559_v44, 0.0 }
 0x230   :  { %v565_v50 = vadd.f32 %v564_v49, %v341_v17  ;;  %v586_v53 = vmax.f32 %v561_v46, 0.0 }
 0x231   :  { %v587_v52 = vmax.f32 %v563_v48, 0.0 }
 0x232   :  { %v588_v54 = vmax.f32 %v565_v50, 0.0 }
 0x233   :  { %v597_v55 = vpack.c.bf16 %v587_v52, %v585_v51 }
 0x234   :  { %v598_v56 = vpack.c.bf16 %v588_v54, %v586_v53  ;;  %v568_v57 = vpop.f32.mrb[12].mxu1 }
 0x235   :  { %v569_v58 = vadd.f32 %v568_v57, %v337_v15  ;;  %v570_v59 = vpop.f32.mrb[13].mxu1 }
 0x236   :  { %v571_v60 = vadd.f32 %v570_v59, %v341_v17  ;;  %v572_v61 = vpop.f32.mrb[14].mxu1  ;;  %784 = vmatprep.mubr.bf16.mxu0 %v598_v56 }
 0x237   :  { %v573_v62 = vadd.f32 %v572_v61, %v337_v15  ;;  %v574_v63 = vpop.f32.mrb[15].mxu1  ;;  %785 = vmatmul.mubr.bf16.gmra.mrb[24].mxu0 %v597_v55  ;;  %v589_v1 = vmax.f32 %v569_v58, 0.0 }
 0x238   :  { %v575_v0 = vadd.f32 %v574_v63, %v341_v17  ;;  %v590_v3 = vmax.f32 %v571_v60, 0.0 }
 0x239   :  { %v591_v2 = vmax.f32 %v573_v62, 0.0 }
 0x23a   :  { %v592_v4 = vmax.f32 %v575_v0, 0.0 }
 0x23b   :  { %v599_v5 = vpack.c.bf16 %v591_v2, %v589_v1 }
 0x23c   :  { %v600_v6 = vpack.c.bf16 %v592_v4, %v590_v3 }
 0x23e   :  { %792 = vmatprep.mubr.bf16.mxu0 %v600_v6 }
 0x23f   :  { %793 = vmatmul.mubr.bf16.gmra.mrb[28].mxu0 %v599_v5 }
 0x2fa   :  { %v957_v7 = vpop.f32.mrb[16].mxu0 }
 0x2fb   :  { %v958_v8 = vpop.f32.mrb[17].mxu0 }
 0x2fc   :  { %v959_v12 = vadd.f32 %v958_v8, %v957_v7  ;;  %v960_v16 = vpop.f32.mrb[18].mxu0 }
 0x2fd   :  { %v961_v14 = vpop.f32.mrb[19].mxu0 }
 0x2fe   :  { %v962_v15 = vadd.f32 %v961_v14, %v960_v16  ;;  %v771_v18 = vadd.f32 %v959_v12, %v924_v9 }
 0x300   :  { %v774_v17 = vadd.f32 %v962_v15, %v924_v9  ;;  %v801_v19 = vmul.f32 %v771_v18, %v771_v18 }
 0x302   :  { %v963_v20 = vpop.f32.mrb[20].mxu0  ;;  %809 = vadd.xlane.f32.xlu0 %v801_v19  ;;  %v802_v24 = vmul.f32 %v774_v17, %v774_v17 }
 0x303   :  { %v964_v21 = vpop.f32.mrb[21].mxu0 }
 0x304   :  { %v965_v22 = vadd.f32 %v964_v21, %v963_v20  ;;  %v966_v23 = vpop.f32.mrb[22].mxu0 }
 0x305   :  { %v967_v25 = vpop.f32.mrb[23].mxu0 }
 0x306   :  { %v968_v26 = vadd.f32 %v967_v25, %v966_v23  ;;  %811 = vadd.xlane.f32.xlu0 %v802_v24  ;;  %v779_v27 = vadd.f32 %v965_v22, %v924_v9 }
 0x308   :  { %v782_v28 = vadd.f32 %v968_v26, %v924_v9  ;;  %v803_v29 = vmul.f32 %v779_v27, %v779_v27 }
 0x30a   :  { %v969_v30 = vpop.f32.mrb[24].mxu0  ;;  %813 = vadd.xlane.f32.xlu1 %v803_v29  ;;  %v804_v11 = vmul.f32 %v782_v28, %v782_v28 }
 0x30b   :  { %v970_v31 = vpop.f32.mrb[25].mxu0 }
 0x30c   :  { %v971_v32 = vadd.f32 %v970_v31, %v969_v30  ;;  %v972_v33 = vpop.f32.mrb[26].mxu0 }
 0x30d   :  { %v973_v34 = vpop.f32.mrb[27].mxu0 }
 0x30e   :  { %v787_v10 = vadd.f32 %v971_v32, %v924_v9  ;;  %v974_v13 = vadd.f32 %v973_v34, %v972_v33  ;;  %815 = vadd.xlane.f32.xlu1 %v804_v11 }
 0x310   :  { %v790_v35 = vadd.f32 %v974_v13, %v924_v9  ;;  %v805_v36 = vmul.f32 %v787_v10, %v787_v10 }
 0x312   :  { %v975_v37 = vpop.f32.mrb[28].mxu0  ;;  %817 = vadd.xlane.f32.xlu0 %v805_v36  ;;  %v806_v38 = vmul.f32 %v790_v35, %v790_v35 }
 0x313   :  { %v976_v39 = vpop.f32.mrb[29].mxu0 }
 0x314   :  { %v977_v40 = vadd.f32 %v976_v39, %v975_v37  ;;  %v978_v41 = vpop.f32.mrb[30].mxu0  ;;  %819 = vadd.xlane.f32.xlu1 %v806_v38 }
 0x315   :  { %v979_v42 = vpop.f32.mrb[31].mxu0 }
 0x316   :  { %v795_v43 = vadd.f32 %v977_v40, %v924_v9  ;;  %v980_v44 = vadd.f32 %v979_v42, %v978_v41 }
 0x318   :  { %v798_v45 = vadd.f32 %v980_v44, %v924_v9  ;;  %v807_v46 = vmul.f32 %v795_v43, %v795_v43 }
 0x31a   :  { %821 = vadd.xlane.f32.xlu0 %v807_v46  ;;  %v808_v47 = vmul.f32 %v798_v45, %v798_v45 }
 0x31c   :  { %823 = vadd.xlane.f32.xlu1 %v808_v47 }
 0x38f   :  { %v810_v48 = vpop.xlane.xlu0 %809 }
 0x390   :  { %v825_v49 = vmax.f32 %v810_v48, 1e-24 }
 0x392   :  { %1079 = vrsqrt.f32 %v825_v49 }
 0x393   :  { %v812_v50 = vpop.xlane.xlu0 %811 }
 0x394   :  { %v826_v51 = vmax.f32 %v812_v50, 1e-24 }
 0x396   :  { %1081 = vrsqrt.f32 %v826_v51 }
 0x397   :  { %v814_v52 = vpop.xlane.xlu1 %813 }
 0x398   :  { %v827_v53 = vmax.f32 %v814_v52, 1e-24 }
 0x39a   :  { %1083 = vrsqrt.f32 %v827_v53 }
 0x39b   :  { %v816_v54 = vpop.xlane.xlu1 %815 }
 0x39c   :  { %v1080_v55 = vpop.eup %1079  ;;  %v828_v56 = vmax.f32 %v816_v54, 1e-24 }
 0x39d   :  { %v841_v57 = vmul.f32 %v1080_v55, %v771_v18 }
 0x39e   :  { %1085 = vrsqrt.f32 %v828_v56 }
 0x39f   :  { %849 = vst [vmem:[#allocation10] sm:$0xff] %v841_v57  ;;  %v818_v58 = vpop.xlane.xlu0 %817 }
 0x3a0   :  { %v1082_v59 = vpop.eup %1081  ;;  %v829_v60 = vmax.f32 %v818_v58, 1e-24 }
 0x3a1   :  { %v842_v61 = vmul.f32 %v1082_v59, %v774_v17  ;;  %v820_v62 = vpop.xlane.xlu1 %819 }
 0x3a2   :  { %1087 = vrsqrt.f32 %v829_v60  ;;  %v830_v63 = vmax.f32 %v820_v62, 1e-24 }
 0x3a3   :  { %850 = vst [vmem:[#allocation10 + $0x8] sm:$0xff] %v842_v61 }
 0x3a4   :  { %v1084_v0 = vpop.eup %1083  ;;  %1089 = vrsqrt.f32 %v830_v63 }
 0x3a5   :  { %v843_v1 = vmul.f32 %v1084_v0, %v779_v27 }
 0x3a7   :  { %851 = vst [vmem:[#allocation10 + $0x10] sm:$0xff] %v843_v1  ;;  %v822_v2 = vpop.xlane.xlu0 %821 }
 0x3a8   :  { %v1086_v3 = vpop.eup %1085  ;;  %v831_v4 = vmax.f32 %v822_v2, 1e-24 }
 0x3a9   :  { %v844_v5 = vmul.f32 %v1086_v3, %v782_v28  ;;  %v824_v6 = vpop.xlane.xlu1 %823 }
 0x3aa   :  { %1091 = vrsqrt.f32 %v831_v4  ;;  %v832_v7 = vmax.f32 %v824_v6, 1e-24 }
 0x3ab   :  { %852 = vst [vmem:[#allocation10 + $0x18] sm:$0xff] %v844_v5 }
 0x3ac   :  { %v1088_v8 = vpop.eup %1087  ;;  %1093 = vrsqrt.f32 %v832_v7 }
 0x3ad   :  { %v845_v9 = vmul.f32 %v1088_v8, %v787_v10 }
 0x3ae   :  { %v1090_v12 = vpop.eup %1089 }
 0x3af   :  { %853 = vst [vmem:[#allocation10 + $0x20] sm:$0xff] %v845_v9  ;;  %v846_v16 = vmul.f32 %v1090_v12, %v790_v35 }
 0x3b1   :  { %854 = vst [vmem:[#allocation10 + $0x28] sm:$0xff] %v846_v16 }
 0x3b4   :  { %v1092_v14 = vpop.eup %1091 }
 0x3b5   :  { %v847_v15 = vmul.f32 %v1092_v14, %v795_v43 }
 0x3b6   :  { %v1094_v18 = vpop.eup %1093 }
 0x3b7   :  { %855 = vst [vmem:[#allocation10 + $0x30] sm:$0xff] %v847_v15  ;;  %v848_v17 = vmul.f32 %v1094_v18, %v798_v45 }
 0x3b9   :  { %856 = vst [vmem:[#allocation10 + $0x38] sm:$0xff] %v848_v17 }
 0x3ba   :  { %1194 = shalt.err (!%p1191_p8)
}
 0x3bb   :  { %s1195_s15 = scalar_lea.hbm %s1381_s7, 1024 }
 0x3bc   :  { %p1196_p9 = scmp.ne.s32.totalorder %s1381_s7, %s1195_s15  ;;  %p1199_p10 = scmp.lt.u32.totalorder %s1195_s15, %s1381_s7 }
 0x3be   :  { %p1201_p11 = pnand %p1199_p10, %p1196_p9 }
 0x3c0   :  { %1204 = shalt.err (!%p1201_p11)
}
 0x3c1   :  { %868 = dma.vmem_to_hbm [thread:$0]  %s863_s9, 1024, %s1381_s7, [#allocation4], %s1215_s13, %s1215_s13, %s1216_s14  }
 0x3c2   :  { %1211 = dma.done.wait [#allocation4], 1024  }
 0x3c3   :  { %1212 = vsyncadd [#allocation4], 4294966272 }
 0x3c4   :  { %872 = vsyncpa [#allocation3], 1 }
 0x3c5   :  { %873 = vsyncpa [#allocation6], 1 }
 0x3c6   :  { %874 = vsyncpa [#allocation9], 1 }
 0x3c7   :  { %875 = vsyncpa [#allocation4], 1 }

</bundles_post_ra>
